<compile_context>
chip_gen: v6e
topology: v6e:2x2x1
jax: 0.10.0
libtpu: 0.0.40
codegen_flags: <defaults>
</compile_context>

<pallas_src>
import jax
import jax.numpy as jnp
from jax.experimental import pallas as pl
from jax.experimental.pallas import tpu as pltpu


def _round_up(x, m):
    return (x + m - 1) // m * m


def classify_forward(x_nchw, weight, bias, *, tn=None, tc=None, thw=None):
    """x_nchw: (N, C1, H, W); weight: (C2, C1) [conv weight (C2,C1,1,1) squeezed]; bias: (C2,)."""
    N, C1, H, W = x_nchw.shape
    C2 = weight.shape[0]
    HW = H * W
    itemsize = jnp.dtype(x_nchw.dtype).itemsize
    budget = 4 * 1024 * 1024  # target bytes for one streamed x block

    # ---- channel tile (second-to-last dim of the x block) ----
    if tc is None:
        tc = C1 if C1 <= 1024 else 1024          # full C1 (always legal) or 1024-chunks
    C1p = C1 if tc == C1 else _round_up(C1, tc)  # zero-pad channels only if tiling C1

    # ---- batch tile (leading dim of the x block: unconstrained; out block needs %8 or full) ----
    if tn is None:
        tn = N if N < 8 else 8
    Np = _round_up(N, tn)

    # ---- spatial tile (lane axis) ----
    if thw is None:
        max_thw = max(1, budget // (tn * tc * itemsize))
        if HW <= max_thw:
            thw = HW                              # full extent -> no 128-divisibility needed
        else:
            thw = max(128, (max_thw // 128) * 128)
    HWp = HW if thw == HW else _round_up(HW, thw)

    C2p = _round_up(C2, 128)                      # lane-dense output

    # ---- wrapper-side layout plumbing (no transpose: NCHW -> (N, C1, HW) is free) ----
    x = x_nchw.reshape(N, C1, HW)
    if (Np, C1p, HWp) != (N, C1, HW):
        x = jnp.pad(x, ((0, Np - N), (0, C1p - C1), (0, HWp - HW)))  # zeros: sums unaffected

    w_t = jnp.zeros((C1p, C2p), jnp.float32).at[:C1, :C2].set(weight.T.astype(jnp.float32))
    b = jnp.zeros((1, C2p), jnp.float32).at[:, :C2].set(bias.astype(jnp.float32))

    inv_hw = 1.0 / float(HW)  # static: divide by the TRUE H*W

    def kernel(x_ref, w_ref, b_ref, o_ref, acc_ref):
        c = pl.program_id(1)
        h = pl.program_id(2)
        nc = pl.num_programs(1)
        nh = pl.num_programs(2)

        @pl.when(h == 0)
        def _():
            acc_ref[...] = jnp.zeros_like(acc_ref)

        # Partial global-average-pool: raw f32 sums over this HW tile (lane-axis reduce).
        acc_ref[...] += jnp.sum(x_ref[...].astype(jnp.float32), axis=2)  # (tn, tc)

        @pl.when(h == nh - 1)
        def _():
            pooled = acc_ref[...] * inv_hw                                # (tn, tc)
            part = jnp.dot(pooled, w_ref[...],
                           preferred_element_type=jnp.float32)            # (tn, C2p) on MXU

            @pl.when(c == 0)
            def _():
                o_ref[...] = part                      # first C1 tile: overwrite stale block

            @pl.when(c > 0)
            def _():
                o_ref[...] += part                     # accumulate remaining C1 tiles

            @pl.when(c == nc - 1)
            def _():
                o_ref[...] += b_ref[...]               # bias once, at the very end

    grid = (Np // tn, C1p // tc, HWp // thw)

    out = pl.pallas_call(
        kernel,
        out_shape=jax.ShapeDtypeStruct((Np, C2p), jnp.float32),
        grid_spec=pltpu.PrefetchScalarGridSpec(
            num_scalar_prefetch=0,
            grid=grid,
            in_specs=[
                pl.BlockSpec((tn, tc, thw), lambda n, c, h: (n, c, h)),  # streamed x tiles
                pl.BlockSpec((tc, C2p), lambda n, c, h: (c, 0)),         # weight tile per C1 tile
                pl.BlockSpec((1, C2p), lambda n, c, h: (0, 0)),          # resident bias
            ],
            out_specs=pl.BlockSpec((tn, C2p), lambda n, c, h: (n, 0)),   # resident across c, h
            scratch_shapes=[pltpu.VMEM((tn, tc), jnp.float32)],          # pooling accumulator
        ),
        compiler_params=pltpu.CompilerParams(
            dimension_semantics=("parallel", "arbitrary", "arbitrary"),
            vmem_limit_bytes=32 * 1024 * 1024,
        ),
        cost_estimate=pl.CostEstimate(
            flops=Np * C1p * HWp + 2 * Np * C1p * C2p,
            transcendentals=0,
            bytes_accessed=Np * C1p * HWp * itemsize + C1p * C2p * 4 + Np * C2p * 4,
        ),
    )(x, w_t, b)

    return out[:N, :C2]


def reference_forward(x_nchw, weight, bias):
    # Pure-JAX reference of the PyTorch forward (single-tensor path).
    pooled = jnp.mean(x_nchw, axis=(2, 3))          # (N, C1)
    return pooled @ weight.T + bias[None, :]        # (N, C2)


if __name__ == "__main__":
    key = jax.random.PRNGKey(0)
    k_x, k_w, k_b = jax.random.split(key, 3)

    # Small shapes consistent with the module: c1=4 input channels, c2=8 classes.
    N, C1, H, W = 2, 4, 16, 16
    C2 = 8

    x = jax.random.normal(k_x, (N, C1, H, W), dtype=jnp.float32)
    # Conv weight (C2, C1, 1, 1) collapsed to (C2, C1); bias (C2,).
    weight = jax.random.normal(k_w, (C2, C1), dtype=jnp.float32) * 0.1
    bias = jax.random.normal(k_b, (C2,), dtype=jnp.float32) * 0.01

    # TODO(synk): the module's list-input path (torch.cat of pooled feature maps along C)
    # maps to calling this kernel per tensor and concatenating pooled channels upstream;
    # only the single-tensor path is implemented here.
    out = classify_forward(x, weight, bias)
    out = jax.block_until_ready(out)

    ref = reference_forward(x, weight, bias)
    assert out.shape == (N, C2), out.shape
    assert jnp.allclose(out, ref, atol=1e-5, rtol=1e-5), (out, ref)

    print("KERNEL_OK")
</pallas_src>

<mosaic_0001>
module attributes {stable_mosaic.version = 11 : i64} {
  func.func @kernel(%arg0: i32, %arg1: i32, %arg2: i32, %arg3: memref<2x4x256xf32, #tpu.memory_space<vmem>>, %arg4: memref<4x128xf32, #tpu.memory_space<vmem>>, %arg5: memref<1x128xf32, #tpu.memory_space<vmem>>, %arg6: memref<2x128xf32, #tpu.memory_space<vmem>>, %arg7: memref<2x4xf32, #tpu.memory_space<vmem>>) attributes {dimension_semantics = [#tpu.dimension_semantics<parallel>, #tpu.dimension_semantics<arbitrary>, #tpu.dimension_semantics<arbitrary>], iteration_bounds = array<i64: 1, 1, 1>, scalar_prefetch = 0 : i64, scratch_operands = 1 : i64, tpu.core_type = #tpu.core_type<tc>, window_params = [{transform_indices = @transform_0, window_bounds = array<i64: 2, 4, 256>}, {transform_indices = @transform_1, window_bounds = array<i64: 4, 128>}, {pipeline_mode = #tpu.pipeline_mode<synchronous>, transform_indices = @transform_2, window_bounds = array<i64: 1, 128>}, {transform_indices = @transform_3, window_bounds = array<i64: 2, 128>}]} {
    %c0_i32 = arith.constant 0 : i32
    %0 = arith.cmpi eq, %arg2, %c0_i32 : i32
    %1 = arith.extui %0 : i1 to i32
    %c0_i32_0 = arith.constant 0 : i32
    %2 = arith.cmpi ne, %1, %c0_i32_0 : i32
    scf.if %2 {
      %cst_9 = arith.constant 0.000000e+00 : f32
      %11 = vector.broadcast %cst_9 : f32 to vector<2x4xf32>
      %c0_10 = arith.constant 0 : index
      %c0_11 = arith.constant 0 : index
      %12 = vector.load %arg7[%c0_10, %c0_11] : memref<2x4xf32, #tpu.memory_space<vmem>>, vector<2x4xf32>
      tpu.vector_store %arg7[%c0_10, %c0_11], %11 {strides = array<i32>} : memref<2x4xf32, #tpu.memory_space<vmem>>, vector<2x4xf32>,
    } else {
    }
    %c0 = arith.constant 0 : index
    %c0_1 = arith.constant 0 : index
    %3 = vector.load %arg7[%c0, %c0_1] : memref<2x4xf32, #tpu.memory_space<vmem>>, vector<2x4xf32>
    %c0_2 = arith.constant 0 : index
    %c0_3 = arith.constant 0 : index
    %c0_4 = arith.constant 0 : index
    %4 = vector.load %arg3[%c0_2, %c0_3, %c0_4] : memref<2x4x256xf32, #tpu.memory_space<vmem>>, vector<2x4x256xf32>
    %cst = arith.constant dense<0.000000e+00> : vector<2x4xf32>
    %5 = vector.multi_reduction <add>, %4, %cst [2] : vector<2x4x256xf32> to vector<2x4xf32>
    %6 = arith.addf %3, %5 : vector<2x4xf32>
    %c0_5 = arith.constant 0 : index
    %c0_6 = arith.constant 0 : index
    %7 = vector.load %arg7[%c0_5, %c0_6] : memref<2x4xf32, #tpu.memory_space<vmem>>, vector<2x4xf32>
    tpu.vector_store %arg7[%c0_5, %c0_6], %6 {strides = array<i32>} : memref<2x4xf32, #tpu.memory_space<vmem>>, vector<2x4xf32>,
    %c0_i32_7 = arith.constant 0 : i32
    %8 = arith.cmpi eq, %arg2, %c0_i32_7 : i32
    %9 = arith.extui %8 : i1 to i32
    %c0_i32_8 = arith.constant 0 : i32
    %10 = arith.cmpi ne, %9, %c0_i32_8 : i32
    scf.if %10 {
      %c0_9 = arith.constant 0 : index
      %c0_10 = arith.constant 0 : index
      %11 = vector.load %arg7[%c0_9, %c0_10] : memref<2x4xf32, #tpu.memory_space<vmem>>, vector<2x4xf32>
      %cst_11 = arith.constant 3.906250e-03 : f32
      %12 = vector.broadcast %cst_11 : f32 to vector<2x4xf32>
      %13 = arith.mulf %11, %12 : vector<2x4xf32>
      %c0_12 = arith.constant 0 : index
      %c0_13 = arith.constant 0 : index
      %14 = vector.load %arg4[%c0_12, %c0_13] : memref<4x128xf32, #tpu.memory_space<vmem>>, vector<4x128xf32>
      %cst_14 = arith.constant dense<0.000000e+00> : vector<2x128xf32>
      %15 = tpu.matmul %13, %14, %cst_14 {dimension_numbers = #tpu.dot_dimension_numbers<[1], [0], [0], [1], [0, 0, 1, 1], [], []>} : vector<2x4xf32>, vector<4x128xf32>, vector<2x128xf32> -> vector<2x128xf32>
      %c0_i32_15 = arith.constant 0 : i32
      %16 = arith.cmpi eq, %arg1, %c0_i32_15 : i32
      %17 = arith.extui %16 : i1 to i32
      %c0_i32_16 = arith.constant 0 : i32
      %18 = arith.cmpi ne, %17, %c0_i32_16 : i32
      scf.if %18 {
        %c0_21 = arith.constant 0 : index
        %c0_22 = arith.constant 0 : index
        %25 = vector.load %arg6[%c0_21, %c0_22] : memref<2x128xf32, #tpu.memory_space<vmem>>, vector<2x128xf32>
        tpu.vector_store %arg6[%c0_21, %c0_22], %15 {strides = array<i32>} : memref<2x128xf32, #tpu.memory_space<vmem>>, vector<2x128xf32>,
      } else {
      }
      %c0_i32_17 = arith.constant 0 : i32
      %19 = arith.cmpi sgt, %arg1, %c0_i32_17 : i32
      %20 = arith.extui %19 : i1 to i32
      %c0_i32_18 = arith.constant 0 : i32
      %21 = arith.cmpi ne, %20, %c0_i32_18 : i32
      scf.if %21 {
        %c0_21 = arith.constant 0 : index
        %c0_22 = arith.constant 0 : index
        %25 = vector.load %arg6[%c0_21, %c0_22] : memref<2x128xf32, #tpu.memory_space<vmem>>, vector<2x128xf32>
        %26 = arith.addf %25, %15 : vector<2x128xf32>
        %c0_23 = arith.constant 0 : index
        %c0_24 = arith.constant 0 : index
        %27 = vector.load %arg6[%c0_23, %c0_24] : memref<2x128xf32, #tpu.memory_space<vmem>>, vector<2x128xf32>
        tpu.vector_store %arg6[%c0_23, %c0_24], %26 {strides = array<i32>} : memref<2x128xf32, #tpu.memory_space<vmem>>, vector<2x128xf32>,
      } else {
      }
      %c0_i32_19 = arith.constant 0 : i32
      %22 = arith.cmpi eq, %arg1, %c0_i32_19 : i32
      %23 = arith.extui %22 : i1 to i32
      %c0_i32_20 = arith.constant 0 : i32
      %24 = arith.cmpi ne, %23, %c0_i32_20 : i32
      scf.if %24 {
        %c0_21 = arith.constant 0 : index
        %c0_22 = arith.constant 0 : index
        %25 = vector.load %arg6[%c0_21, %c0_22] : memref<2x128xf32, #tpu.memory_space<vmem>>, vector<2x128xf32>
        %c0_23 = arith.constant 0 : index
        %c0_24 = arith.constant 0 : index
        %26 = vector.load %arg5[%c0_23, %c0_24] : memref<1x128xf32, #tpu.memory_space<vmem>>, vector<1x128xf32>
        %27 = vector.broadcast %26 : vector<1x128xf32> to vector<2x128xf32>
        %28 = arith.addf %25, %27 : vector<2x128xf32>
        %c0_25 = arith.constant 0 : index
        %c0_26 = arith.constant 0 : index
        %29 = vector.load %arg6[%c0_25, %c0_26] : memref<2x128xf32, #tpu.memory_space<vmem>>, vector<2x128xf32>
        tpu.vector_store %arg6[%c0_25, %c0_26], %28 {strides = array<i32>} : memref<2x128xf32, #tpu.memory_space<vmem>>, vector<2x128xf32>,
      } else {
      }
    } else {
    }
    return
  }
  func.func @transform_0(%arg0: i32, %arg1: i32, %arg2: i32) -> (i32, i32, i32) {
    %c0_i32 = arith.constant 0 : i32
    return %arg0, %arg1, %arg2 : i32, i32, i32
  }
  func.func @transform_1(%arg0: i32, %arg1: i32, %arg2: i32) -> (i32, i32) {
    %c0_i32 = arith.constant 0 : i32
    %c0_i32_0 = arith.constant 0 : i32
    return %arg1, %c0_i32 : i32, i32
  }
  func.func @transform_2(%arg0: i32, %arg1: i32, %arg2: i32) -> (i32, i32) {
    %c0_i32 = arith.constant 0 : i32
    %c0_i32_0 = arith.constant 0 : i32
    %c0_i32_1 = arith.constant 0 : i32
    return %c0_i32, %c0_i32_0 : i32, i32
  }
  func.func @transform_3(%arg0: i32, %arg1: i32, %arg2: i32) -> (i32, i32) {
    %c0_i32 = arith.constant 0 : i32
    %c0_i32_0 = arith.constant 0 : i32
    return %arg0, %c0_i32 : i32, i32
  }
}

</mosaic_0001>

<bundles_post_ra>
// kernel: tpu_custom_call.1
= control target key start
LH: loop header
LB: loop body
LE: loop exit
PB: predicated region body
PF: predicated region fallthrough
CT: control target
= control target key end

     0   :  { %8 = vsyncpa [#allocation4], 0  ;;  %s340_s0 = inlined_call_operand.hbm [shape: f32[2,4,256], index: 0, kind: input, shape index: {}]   ;;  %s341_s1 = inlined_call_operand.hbm [shape: f32[4,128], index: 1, kind: input, shape index: {}]   ;;  %s342_s2 = inlined_call_operand.vmem [shape: f32[1,128], index: 2, kind: input, shape index: {}]   ;;  %s343_s3 = inlined_call_operand.hbm [shape: f32[2,128], index: 3, kind: output, shape index: {}]  }
   0x1   :  { %9 = vsyncpa [#allocation7], 0 }
   0x2   :  { %10 = vsyncpa [#allocation5], 0  ;;  %s294_s12 = smov [#allocation3]  }
   0x3   :  { %s16_s13 = sshll.u32 %s294_s12, 4  ;;  %s17_s13 = int_to_ptr.vmem [resolvable:$true] %s16_s13 }
   0x4   :  { %s236_s14 = scalar_lea.vmem %s17_s13, 256  ;;  %p241_p1 = scmp.lt.s32.totalorder %s17_s13, %s17_s13 }
   0x5   :  { %p237_p0 = scmp.ne.s32.totalorder %s17_s13, %s236_s14  ;;  %p242_p2 = scmp.lt.s32.totalorder %s236_s14, %s236_s14 }
   0x7   :  { %p243_p3 = por %p242_p2, %p241_p1 }
   0x9   :  { %p244_p4 = pnand %p243_p3, %p237_p0 }
   0xb   :  { %247 = shalt.err (!%p244_p4)
}
   0xc   :  { %s295_s15 = smov 128   ;;  %s296_s16 = smov 8  }
   0xd   :  { %22 = dma.hbm_to_vmem [thread:$0]  %s340_s0, 256, %s17_s13, [#allocation4], %s295_s15, %s295_s15, %s296_s16  }
   0xe   :  { %s297_s19 = smov [#allocation6]  }
   0xf   :  { %s29_s20 = sshll.u32 %s297_s19, 4  ;;  %s30_s20 = int_to_ptr.vmem [resolvable:$true] %s29_s20 }
  0x10   :  { %s256_s21 = scalar_lea.vmem %s30_s20, 64  ;;  %p261_p6 = scmp.lt.s32.totalorder %s30_s20, %s30_s20 }
  0x11   :  { %p257_p5 = scmp.ne.s32.totalorder %s30_s20, %s256_s21  ;;  %p262_p7 = scmp.lt.s32.totalorder %s256_s21, %s256_s21 }
  0x13   :  { %p263_p8 = por %p262_p7, %p261_p6 }
  0x15   :  { %p264_p9 = pnand %p263_p8, %p257_p5 }
  0x17   :  { %267 = shalt.err (!%p264_p9)
}
  0x18   :  { %32 = dma.hbm_to_vmem [thread:$0]  %s341_s1, 64, %s30_s20, [#allocation7]  }
  0x19   :  { %288 = dma.done.wait [#allocation4], 256  }
  0x1a   :  { %289 = vsyncadd [#allocation4], 4294967040 }
  0x1b   :  { %290 = dma.done.wait [#allocation7], 64  }
  0x1c   :  { %291 = vsyncadd [#allocation7], 4294967232  ;;  %vm56_vm0 = vcmask 1043456   ;;  %v48_v0 = vld [vmem:[#allocation3] sm:$0xff]  ;;  %v49_v1 = vld [vmem:[#allocation3 + $0x8] sm:$0xff]  ;;  %vm45_vm1 = vcmask 25600   ;;  %v69_v12 = vlaneseq }
  0x1d   :  { %v52_v2 = vcombine.high %v48_v0, %v48_v0  ;;  %v57_v3 = vsel %vm56_vm0, %v48_v0, 0.0  ;;  %v53_v4 = vcombine.high %v49_v1, %v49_v1  ;;  %v62_v6 = vsel %vm56_vm0, %v49_v1, 0.0  ;;  %v90_v11 = vld [vmem:[#allocation6] sm:$0xf]  ;;  %v211_v27 = vld [vmem:[%s342_s2] ss:$0 sm:$0xff] }
  0x1e   :  { %v298_v10 = vmov 0.0   ;;  %vm299_vm2 = vmmov 0   ;;  %v70_v13 = vand.u32 127, %v69_v12  ;;  %v72_v14 = vshrl.u32 %v69_v12, 7  ;;  %s300_s24 = smov [#allocation8]  }
  0x1f   :  { %v58_v5 = vsel %vm56_vm0, %v52_v2, 0.0  ;;  %v63_v7 = vsel %vm56_vm0, %v53_v4, 0.0  ;;  %46 = vst.msk [vmem:[#allocation2] sm:$0x3] %vm45_vm1, %v298_v10  ;;  %214 = vmatprep.subr.mxu0 %v298_v10  ;;  %216 = vmatprep.mubr.msk.f32.mxu0 %vm299_vm2, %v298_v10  ;;  %vm79_vm3 = vcmask 1041409   ;;  %vm91_vm4 = vcmask 31744  }
  0x20   :  { %v59_v8 = vadd.f32 %v58_v5, %v57_v3  ;;  %v64_v9 = vadd.f32 %v63_v7, %v62_v6  ;;  %215 = vmatpush3.msk.msra.mxu0 %vm56_vm0, %v90_v11  ;;  %v73_v16 = vsub.s32 %v70_v13, %v72_v14  ;;  %s199_s25 = sshll.u32 %s300_s24, 4  ;;  %s200_s25 = int_to_ptr.vmem [resolvable:$true] %s199_s25 }
  0x21   :  { %s268_s26 = scalar_lea.vmem %s200_s25, 32  ;;  %p273_p11 = scmp.lt.s32.totalorder %s200_s25, %s200_s25 }
  0x22   :  { %60 = vadd.xlane.f32.xlu0 %v59_v8  ;;  %p269_p10 = scmp.ne.s32.totalorder %s200_s25, %s268_s26  ;;  %p274_p12 = scmp.lt.s32.totalorder %s268_s26, %s268_s26 }
  0x24   :  { %p275_p13 = por %p274_p12, %p273_p11 }
  0x26   :  { %65 = vadd.xlane.f32.xlu0 %v64_v9  ;;  %v47_v20 = vld [vmem:[#allocation2] sm:$0x3]  ;;  %p276_p0 = pnand %p275_p13, %p269_p10 }
  0xab   :  { %v61_v15 = vpop.xlane.xlu0 %60 }
  0xac   :  { %v74_v18 = vrot.slane %v61_v15, %v73_v16 }
  0xaf   :  { %v66_v17 = vpop.xlane.xlu0 %65 }
  0xb0   :  { %v78_v19 = vrot.slane %v66_v17, %v73_v16 }
  0xb2   :  { %v80_v21 = vsel %vm79_vm3, %v78_v19, %v74_v18 }
  0xb3   :  { %v82_v22 = vadd.f32 %v80_v21, %v47_v20 }
  0xb5   :  { %84 = vst.msk [vmem:[#allocation2] sm:$0x3] %vm45_vm1, %v82_v22 }
  0xbc   :  { %v88_v23 = vld [vmem:[#allocation2] sm:$0x3] }
  0xbd   :  { %v89_v24 = vmul.f32 0.00390625, %v88_v23 }
  0xbf   :  { %217 = vmatmul.mubr.msk.f32.vlgmr.msra.gmra.mxu0 %vm91_vm4, %v89_v24 }
 0x17f   :  { %v164_v25 = vpop.f32.mrf.mxu0 }
 0x180   :  { %172 = vst [vmem:[#allocation8] sm:$0x3] %v164_v25 }
 0x181   :  { %v218_v26 = vpop.f32.mrf.mxu0 }
 0x187   :  { %v183_v28 = vld [vmem:[#allocation8] sm:$0x3] }
 0x188   :  { %v191_v29 = vadd.f32 %v211_v27, %v183_v28 }
 0x18a   :  { %192 = vst [vmem:[#allocation8] sm:$0x3] %v191_v29 }
 0x18b   :  { %279 = shalt.err (!%p276_p0)
}
 0x18c   :  { %202 = dma.vmem_to_hbm [thread:$0]  %s200_s25, 32, %s343_s3, [#allocation5]  }
 0x18d   :  { %292 = dma.done.wait [#allocation5], 32  }
 0x18e   :  { %293 = vsyncadd [#allocation5], 4294967264 }
 0x18f   :  { %206 = vsyncpa [#allocation4], 1 }
 0x190   :  { %207 = vsyncpa [#allocation7], 1 }
 0x191   :  { %208 = vsyncpa [#allocation5], 1 }

</bundles_post_ra>
